<compile_context>
chip_gen: v7x
topology: tpu7x:2x2x1
jax: 0.10.0
libtpu: 0.0.40
codegen_flags: <defaults>
</compile_context>

<pallas_src>
import jax
import jax.numpy as jnp
from jax.experimental import pallas as pl
from jax.experimental.pallas import tpu as pltpu


def _linear_kernel(x_ref, w_ref, b_ref, o_ref):
    # Cast the x tile to the weight dtype explicitly:
    #  * bf16 weights (cast_weights_to=bf16): no-op for bf16 x -> single-pass bf16 x bf16
    #    MXU matmul with f32 accumulation (the native fast path on v5e/v6e/v7x).
    #  * f32 weights (default, bit-matches torch's .to(float32) + Linear): a documented
    #    per-tile VPU upcast of x followed by a (slower, multi-pass) f32 MXU matmul.
    x = x_ref[...].astype(w_ref.dtype)
    acc = jnp.dot(x, w_ref[...], preferred_element_type=jnp.float32)
    o_ref[...] = (acc + b_ref[...]).astype(o_ref.dtype)


def _round_up(v, m):
    return ((v + m - 1) // m) * m


def _padded_vmem_bytes(rows, cols, itemsize):
    # VMEM tiles pad the second-minor dim to the sublane packing and the minor dim to 128.
    sub = max(8, 32 // itemsize)
    return _round_up(rows, sub) * _round_up(cols, 128) * itemsize


def _pick_tm(n, sublane, tm_max):
    # tm is purely a DMA-amortization knob here (the kernel is HBM-bound): larger blocks
    # approach the HBM roofline, but for small node counts we want >= ~4 near-equal blocks
    # so v7x's two TensorCores both get balanced work under dimension_semantics=parallel.
    target_blocks = 4
    tm = _round_up(max(1, pl.cdiv(n, target_blocks)), sublane)
    return max(sublane, min(tm, tm_max))


def linear_node_encoder(x, w, b, *, tm=None, tm_max=512,
                        out_dtype=jnp.float32, cast_weights_to=None):
    """Pallas TPU forward of LinearNodeEncoder: Linear(x.astype(float32)).

    x: (N, C_in)      node features, any float dtype (bf16 recommended in HBM)
    w: (C_in, C_out)  weight (already transposed vs torch Linear.weight)
    b: (C_out,)       bias
    tm: node-row tile; None -> auto (large blocks, balanced across v7x TCs), capped at tm_max
    out_dtype: f32 matches the torch path; bf16 halves the dominant output writeback
    cast_weights_to: e.g. jnp.bfloat16 -> native bf16 MXU path (slight numeric deviation)
    returns: (N, C_out) in out_dtype
    """
    n, c_in = x.shape
    c_out = w.shape[1]
    assert w.shape[0] == c_in and b.shape == (c_out,)

    if cast_weights_to is not None:
        w = w.astype(cast_weights_to)
        x = x.astype(cast_weights_to)   # feed the MXU its native low-precision format

    # Lane-dense output: pad C_out to a multiple of 128 (unmasked vst), slice pad off later.
    c_out_p = _round_up(c_out, 128)
    if c_out_p != c_out:
        w = jnp.pad(w, ((0, 0), (0, c_out_p - c_out)))
        b = jnp.pad(b, (0, c_out_p - c_out))
    b2 = b.reshape(1, c_out_p).astype(jnp.float32)

    # Row tile: multiple of x's sublane packing (8 f32 / 16 bf16 / 32 int8).
    sub = max(8, 32 // jnp.dtype(x.dtype).itemsize)
    if tm is None:
        tm = _pick_tm(n, sub, tm_max)
    else:
        tm = max(sub, (tm // sub) * sub)

    grid = (pl.cdiv(n, tm),)  # ragged N: tail block is partial, OOB stores are masked

    out_itemsize = jnp.dtype(out_dtype).itemsize
    cost = pl.CostEstimate(
        flops=2 * n * c_in * c_out_p,
        transcendentals=0,
        # Weight/bias counted once (resident, constant index_map); revisit if a K
        # reduction grid axis is ever added.
        bytes_accessed=(x.size * x.dtype.itemsize + w.size * w.dtype.itemsize
                        + b2.size * 4 + n * c_out_p * out_itemsize),
    )

    # Explicit VMEM budget: double-buffered streamed x/out tiles + single-buffered resident
    # weight/bias (+ slack).  Keeps tm large without tripping the default scoped limit and
    # stays well inside v7x's 64 MiB physical VMEM at these widths.
    # TODO(synk): at production widths where this exceeds ~48 MiB on v7x, add a K reduction
    # grid axis with an f32 acc scratch + pl.when init/finalize instead of shrinking tm.
    need = (2 * _padded_vmem_bytes(tm, c_in, x.dtype.itemsize)
            + 2 * _padded_vmem_bytes(tm, c_out_p, out_itemsize)
            + _padded_vmem_bytes(c_in, c_out_p, w.dtype.itemsize)
            + _padded_vmem_bytes(1, c_out_p, 4))
    vmem_limit = int(min(max(2 * need + (2 << 20), 16 << 20), 64 << 20))

    def build(single_buffer_resident):
        resident = dict(pipeline_mode=pl.Buffered(1)) if single_buffer_resident else {}
        return pl.pallas_call(
            _linear_kernel,
            out_shape=jax.ShapeDtypeStruct((n, c_out_p), out_dtype),
            grid_spec=pltpu.PrefetchScalarGridSpec(
                num_scalar_prefetch=0,
                grid=grid,
                in_specs=[
                    pl.BlockSpec((tm, c_in), lambda i: (i, 0)),                   # streamed x rows
                    pl.BlockSpec((c_in, c_out_p), lambda i: (0, 0), **resident),  # resident weight
                    pl.BlockSpec((1, c_out_p), lambda i: (0, 0), **resident),     # resident bias
                ],
                out_specs=pl.BlockSpec((tm, c_out_p), lambda i: (i, 0)),
            ),
            compiler_params=pltpu.CompilerParams(
                dimension_semantics=("parallel",),   # shards row blocks across v7x TCs
                vmem_limit_bytes=vmem_limit,
            ),
            cost_estimate=cost,
        )

    try:
        out = build(True)(x, w, b2)
    except Exception:
        # Fallback if this jax version rejects pipeline_mode / Buffered(1) on inputs:
        # default double-buffering of the resident blocks (correct, slightly more VMEM).
        out = build(False)(x, w, b2)

    if c_out_p != c_out:
        out = out[:, :c_out]
    return out


def init_linear_params(key, input_channels, output_channels):
    """Deterministic init matching torch.nn.Linear's U(-1/sqrt(fan_in), 1/sqrt(fan_in))."""
    kw, kb = jax.random.split(key)
    bound = 1.0 / jnp.sqrt(jnp.float32(input_channels))
    w = jax.random.uniform(kw, (input_channels, output_channels),
                           dtype=jnp.float32, minval=-bound, maxval=bound)
    b = jax.random.uniform(kb, (output_channels,),
                           dtype=jnp.float32, minval=-bound, maxval=bound)
    return w, b


if __name__ == "__main__":
    key = jax.random.PRNGKey(0)
    k_x, k_p = jax.random.split(key)

    num_nodes = 300          # deliberately not a tile multiple -> exercises ragged tail
    input_channels = 16
    output_channels = 128    # lane-dense main case; a non-128 width is tested below

    x = jax.random.normal(k_x, (num_nodes, input_channels), dtype=jnp.bfloat16)
    w, b = init_linear_params(k_p, input_channels, output_channels)
    ref = x.astype(jnp.float32) @ w + b   # the torch float32 path

    # 1) torch-exact f32 path; auto tm -> 80-row blocks: 4 near-equal blocks, 2 per v7x TC.
    out = linear_node_encoder(x, w, b)
    jax.block_until_ready(out)
    assert out.shape == (num_nodes, output_channels) and out.dtype == jnp.float32
    assert jnp.allclose(out, ref, atol=1e-5, rtol=1e-5)

    # 2) bf16 MXU fast path + bf16 output (halves weight HBM and output writeback streams).
    out_fast = linear_node_encoder(x, w, b, cast_weights_to=jnp.bfloat16,
                                   out_dtype=jnp.bfloat16)
    jax.block_until_ready(out_fast)
    assert out_fast.dtype == jnp.bfloat16
    assert jnp.allclose(out_fast.astype(jnp.float32), ref, atol=5e-2, rtol=5e-2)

    # 3) non-multiple-of-128 output width -> padded to lane-dense inside the wrapper.
    c96 = 96
    out96 = linear_node_encoder(x, w[:, :c96], b[:c96])
    jax.block_until_ready(out96)
    assert out96.shape == (num_nodes, c96) and out96.dtype == jnp.float32
    assert jnp.allclose(out96, ref[:, :c96], atol=1e-5, rtol=1e-5)

    # TODO(synk): the torch module mutates a PyG `batch` container in place; only the
    # batch.x tensor transform is implemented here (container plumbing stays in Python).
    print("KERNEL_OK")
</pallas_src>

<mosaic_0001>
module attributes {stable_mosaic.version = 11 : i64} {
  func.func @_linear_kernel(%arg0: i32, %arg1: memref<80x16xbf16, #tpu.memory_space<vmem>>, %arg2: memref<16x128xf32, #tpu.memory_space<vmem>>, %arg3: memref<1x128xf32, #tpu.memory_space<vmem>>, %arg4: memref<80x128xf32, #tpu.memory_space<vmem>>) attributes {dimension_semantics = [#tpu.dimension_semantics<parallel>], iteration_bounds = array<i64: 4>, scalar_prefetch = 0 : i64, scratch_operands = 0 : i64, tpu.core_type = #tpu.core_type<tc>, window_params = [{transform_indices = @transform_0, window_bounds = array<i64: 80, 16>}, {pipeline_mode = #tpu.pipeline_mode<synchronous>, transform_indices = @transform_1, window_bounds = array<i64: 16, 128>}, {pipeline_mode = #tpu.pipeline_mode<synchronous>, transform_indices = @transform_2, window_bounds = array<i64: 1, 128>}, {transform_indices = @transform_3, window_bounds = array<i64: 80, 128>}]} {
    %c0 = arith.constant 0 : index
    %c0_0 = arith.constant 0 : index
    %0 = vector.load %arg1[%c0, %c0_0] : memref<80x16xbf16, #tpu.memory_space<vmem>>, vector<80x16xbf16>
    %1 = arith.extf %0 : vector<80x16xbf16> to vector<80x16xf32>
    %c0_1 = arith.constant 0 : index
    %c0_2 = arith.constant 0 : index
    %2 = vector.load %arg2[%c0_1, %c0_2] : memref<16x128xf32, #tpu.memory_space<vmem>>, vector<16x128xf32>
    %cst = arith.constant dense<0.000000e+00> : vector<80x128xf32>
    %3 = tpu.matmul %1, %2, %cst {dimension_numbers = #tpu.dot_dimension_numbers<[1], [0], [0], [1], [0, 0, 1, 1], [], []>} : vector<80x16xf32>, vector<16x128xf32>, vector<80x128xf32> -> vector<80x128xf32>
    %c0_3 = arith.constant 0 : index
    %c0_4 = arith.constant 0 : index
    %4 = vector.load %arg3[%c0_3, %c0_4] : memref<1x128xf32, #tpu.memory_space<vmem>>, vector<1x128xf32>
    %5 = vector.broadcast %4 : vector<1x128xf32> to vector<80x128xf32>
    %6 = arith.addf %3, %5 : vector<80x128xf32>
    %c0_5 = arith.constant 0 : index
    %c0_6 = arith.constant 0 : index
    %7 = vector.load %arg4[%c0_5, %c0_6] : memref<80x128xf32, #tpu.memory_space<vmem>>, vector<80x128xf32>
    tpu.vector_store %arg4[%c0_5, %c0_6], %6 {strides = array<i32>} : memref<80x128xf32, #tpu.memory_space<vmem>>, vector<80x128xf32>,
    return
  }
  func.func @transform_0(%arg0: i32) -> (i32, i32) {
    %c0_i32 = arith.constant 0 : i32
    %c0_i32_0 = arith.constant 0 : i32
    return %arg0, %c0_i32 : i32, i32
  }
  func.func @transform_1(%arg0: i32) -> (i32, i32) {
    %c0_i32 = arith.constant 0 : i32
    %c0_i32_0 = arith.constant 0 : i32
    %c0_i32_1 = arith.constant 0 : i32
    return %c0_i32, %c0_i32_0 : i32, i32
  }
  func.func @transform_2(%arg0: i32) -> (i32, i32) {
    %c0_i32 = arith.constant 0 : i32
    %c0_i32_0 = arith.constant 0 : i32
    %c0_i32_1 = arith.constant 0 : i32
    return %c0_i32, %c0_i32_0 : i32, i32
  }
  func.func @transform_3(%arg0: i32) -> (i32, i32) {
    %c0_i32 = arith.constant 0 : i32
    %c0_i32_0 = arith.constant 0 : i32
    return %arg0, %c0_i32 : i32, i32
  }
}

module attributes {stable_mosaic.version = 11 : i64} {
  func.func @_linear_kernel(%arg0: i32, %arg1: memref<80x16xbf16, #tpu.memory_space<vmem>>, %arg2: memref<16x128xf32, #tpu.memory_space<vmem>>, %arg3: memref<1x128xf32, #tpu.memory_space<vmem>>, %arg4: memref<80x128xf32, #tpu.memory_space<vmem>>) attributes {dimension_semantics = [#tpu.dimension_semantics<parallel>], iteration_bounds = array<i64: 4>, scalar_prefetch = 0 : i64, scratch_operands = 0 : i64, tpu.core_type = #tpu.core_type<tc>, window_params = [{transform_indices = @transform_0, window_bounds = array<i64: 80, 16>}, {pipeline_mode = #tpu.pipeline_mode<synchronous>, transform_indices = @transform_1, window_bounds = array<i64: 16, 128>}, {pipeline_mode = #tpu.pipeline_mode<synchronous>, transform_indices = @transform_2, window_bounds = array<i64: 1, 128>}, {transform_indices = @transform_3, window_bounds = array<i64: 80, 128>}]} {
    %c0 = arith.constant 0 : index
    %c0_0 = arith.constant 0 : index
    %0 = vector.load %arg1[%c0, %c0_0] : memref<80x16xbf16, #tpu.memory_space<vmem>>, vector<80x16xbf16>
    %1 = arith.extf %0 : vector<80x16xbf16> to vector<80x16xf32>
    %c0_1 = arith.constant 0 : index
    %c0_2 = arith.constant 0 : index
    %2 = vector.load %arg2[%c0_1, %c0_2] : memref<16x128xf32, #tpu.memory_space<vmem>>, vector<16x128xf32>
    %cst = arith.constant dense<0.000000e+00> : vector<80x128xf32>
    %3 = tpu.matmul %1, %2, %cst {dimension_numbers = #tpu.dot_dimension_numbers<[1], [0], [0], [1], [0, 0, 1, 1], [], []>} : vector<80x16xf32>, vector<16x128xf32>, vector<80x128xf32> -> vector<80x128xf32>
    %c0_3 = arith.constant 0 : index
    %c0_4 = arith.constant 0 : index
    %4 = vector.load %arg3[%c0_3, %c0_4] : memref<1x128xf32, #tpu.memory_space<vmem>>, vector<1x128xf32>
    %5 = vector.broadcast %4 : vector<1x128xf32> to vector<80x128xf32>
    %6 = arith.addf %3, %5 : vector<80x128xf32>
    %c0_5 = arith.constant 0 : index
    %c0_6 = arith.constant 0 : index
    %7 = vector.load %arg4[%c0_5, %c0_6] : memref<80x128xf32, #tpu.memory_space<vmem>>, vector<80x128xf32>
    tpu.vector_store %arg4[%c0_5, %c0_6], %6 {strides = array<i32>} : memref<80x128xf32, #tpu.memory_space<vmem>>, vector<80x128xf32>,
    return
  }
  func.func @transform_0(%arg0: i32) -> (i32, i32) {
    %c0_i32 = arith.constant 0 : i32
    %c0_i32_0 = arith.constant 0 : i32
    return %arg0, %c0_i32 : i32, i32
  }
  func.func @transform_1(%arg0: i32) -> (i32, i32) {
    %c0_i32 = arith.constant 0 : i32
    %c0_i32_0 = arith.constant 0 : i32
    %c0_i32_1 = arith.constant 0 : i32
    return %c0_i32, %c0_i32_0 : i32, i32
  }
  func.func @transform_2(%arg0: i32) -> (i32, i32) {
    %c0_i32 = arith.constant 0 : i32
    %c0_i32_0 = arith.constant 0 : i32
    %c0_i32_1 = arith.constant 0 : i32
    return %c0_i32, %c0_i32_0 : i32, i32
  }
  func.func @transform_3(%arg0: i32) -> (i32, i32) {
    %c0_i32 = arith.constant 0 : i32
    %c0_i32_0 = arith.constant 0 : i32
    return %arg0, %c0_i32 : i32, i32
  }
}

</mosaic_0001>

<bundles_post_ra>
// kernel: tpu_custom_call.1
= control target key start
LH: loop header
LB: loop body
LE: loop exit
PB: predicated region body
PF: predicated region fallthrough
CT: control target
= control target key end

     0   :  { %8 = vsyncpa [#allocation3], 0  ;;  %s829_s0 = inlined_call_operand.vmem [shape: bf16[300,16], index: 0, kind: input, shape index: {}]   ;;  %s830_s1 = inlined_call_operand.vmem [shape: f32[16,128], index: 1, kind: input, shape index: {}]   ;;  %s831_s2 = inlined_call_operand.vmem [shape: f32[1,128], index: 2, kind: input, shape index: {}]   ;;  %s832_s3 = inlined_call_operand.hbm [shape: f32[300,128], index: 3, kind: output, shape index: {}]  }
   0x1   :  { %10 = vsyncpa [#allocation3 + $0x1], 0  ;;  %s676_s12 = smov 0   ;;  %s678_s13 = smov 0  }
   0x2   :  { %s680_s14 = smov 0   ;;  %s682_s15 = smov 0  }
   0x3 LB: > { %s697_s16 = sadd.s32 4294967295, %s651_s15   ;;  %s463_s17 = sadd.s32 4294967294, %s651_s15   ;;  %s651_s15 = sphi %s682_s15, %s838_s15   ;;  %s647_s14 = sphi %s680_s14, %s837_s14   ;;  %s643_s13 = sphi %s678_s13, %s836_s13   ;;  %s639_s12 = sphi %s676_s12, %s835_s12  }
   0x4   : > { %s701_s18 = sadd.s32 1, %s651_s15   ;;  %s91_s19 = sadd.s32 1, %s647_s14 }
   0x5   : > { %s88_s20 = ssub.s32 %s651_s15, %s701_s18  ;;  %p101_p0 = scmp.ne.s32.totalorder %s647_s14, %s643_s13 }
   0x6   : > { %p89_p1 = scmp.eq.s32.totalorder %s88_s20, 0  ;;  %p102_p2 = scmp.eq.s32.totalorder %s697_s16, 3 }
   0x7   : > { %p107_p3 = scmp.ne.s32.totalorder %s643_s13, %s639_s12  ;;  %p108_p4 = scmp.eq.s32.totalorder %s463_s17, 3 }
   0x8   : > { %s712_s21 = scalar_select %p89_p1, %s647_s14, %s91_s19  }
   0x9   : > { %p714_p5 = por %p102_p2, %p101_p0  ;;  %p718_p6 = por %p108_p4, %p107_p3 }
   0xa   : > { %p466_p7 = scmp.ge.s32.totalorder %s651_s15, 1  ;;  %p149_p8 = scmp.lt.s32.totalorder %s651_s15, 5 }
   0xc   : > { %p150_p9 = pnand %p466_p7, %p149_p8 }
   0xd   : > { %v216_v0 = vld [vmem:[%s830_s1] sm:$0xff] (!%p150_p9)  ;;  %v217_v1 = vld [vmem:[%s830_s1 + $0x8] sm:$0xff] (!%p150_p9)  ;;  %s731_s28 = smul.u32 (!%p150_p9), 10, %s697_s16  ;;  %vm225_vm0 = vcmask (!%p150_p9), 130048   ;;  %s174_s7 = sand.u32 (!%p150_p9), 1, %s643_s13  }
   0xe   : > { %153 = sbr.rel (%p150_p9) target bundleno = 281 (0x119), region = 32  ;;  %v542_v2 = vpack.c.bf16 (!%p150_p9), %v217_v1, %v216_v0  ;;  %v468_v18 = vld [vmem:[%s831_s2] ss:$0 sm:$0xff] (!%p150_p9)  ;;  %s768_s17 = scalar_lea.sflag (!%p150_p9), [#allocation3], %s174_s7 }
   0xf   : > { %p182_p10 = scmp.lt.s32.totalorder (!%p150_p9), %s731_s28, 37  ;;  %s548_s8 = smul.u32 (!%p150_p9), 80, %s174_s7 }
  0x10   : > { %543 = vmatprep.subr.bf16.mxu0 (!%p150_p9), %v542_v2  ;;  %546 = vmatprep.subr.bf16.mxu1 (!%p150_p9), %v542_v2 }
  0x11   : > { %545 = vmatpush3.bf16.msra.mxu0 (!%p150_p9), %v542_v2  ;;  %547 = vmatpush3.bf16.msra.mxu1 (!%p150_p9), %v542_v2  ;;  %s754_s11 = scalar_lea.vmem (!%p150_p9), [#allocation2], %s548_s8 }
  0x15   : > { %s183_s29 = scalar_select %p182_p10, %s731_s28, 37 }
  0x16   : > { %s390_s19 = ssub.s32 (%p714_p5), 38, %s731_s28 }
  0x17   : > { %s467_s30 = sshll.u32 %s183_s29, 2  ;;  %p391_p11 = scmp.lt.s32.totalorder (%p714_p5), %s390_s19, 10 }
  0x18   : > { %s185_s6 = scalar_lea.vmem %s829_s0, %s467_s30 }
  0x19   : > { %v488_v3 = vld [vmem:[%s185_s6] sm:$0xff]   ;;  %v509_v4 = vld [vmem:[%s185_s6 + $0x18] sm:$0xff]   ;;  %v507_v5 = vld [vmem:[%s185_s6 + $0x8] sm:$0xff]  }
  0x1a   : > { %v489_v6 = vunpack.c.l.bf16 %v488_v3  ;;  %v490_v7 = vunpack.c.h.bf16 %v488_v3  ;;  %v501_v8 = vunpack.c.l.bf16 %v509_v4  ;;  %v502_v9 = vunpack.c.h.bf16 %v509_v4  ;;  %v510_v10 = vld [vmem:[%s185_s6 + $0x20] sm:$0xff]   ;;  %v508_v13 = vld [vmem:[%s185_s6 + $0x10] sm:$0xff]  }
  0x1b   : > { %v493_v11 = vunpack.c.l.bf16 %v507_v5  ;;  %v505_v12 = vunpack.c.l.bf16 %v510_v10  ;;  %v494_v14 = vunpack.c.h.bf16 %v507_v5  ;;  %v506_v15 = vunpack.c.h.bf16 %v510_v10 }
  0x1c   : > { %527 = vmatprep.mubr.msk.f32.mxu0 %vm225_vm0, %v489_v6  ;;  %536 = vmatprep.mubr.msk.f32.mxu1 %vm225_vm0, %v501_v8  ;;  %v497_v16 = vunpack.c.l.bf16 %v508_v13  ;;  %v498_v17 = vunpack.c.h.bf16 %v508_v13 }
  0x1d   : > { %528 = vmatmul.mubr.msk.f32.vlgmr.msra.gmra.mrb[0].mxu0 %vm225_vm0, %v490_v7  ;;  %537 = vmatmul.mubr.msk.f32.vlgmr.msra.gmra.mrb[0].mxu1 %vm225_vm0, %v502_v9 }
  0x1e   : > { %530 = vmatprep.mubr.msk.f32.mxu0 %vm225_vm0, %v493_v11  ;;  %539 = vmatprep.mubr.msk.f32.mxu1 %vm225_vm0, %v505_v12 }
  0x21   : > { %531 = vmatmul.mubr.msk.f32.gmra.mrb[2].mxu0 %vm225_vm0, %v494_v14  ;;  %540 = vmatmul.mubr.msk.f32.gmra.mrb[2].mxu1 %vm225_vm0, %v506_v15 }
  0x22   : > { %533 = vmatprep.mubr.msk.f32.mxu0 %vm225_vm0, %v497_v16 }
  0x25   : > { %534 = vmatmul.mubr.msk.f32.gmra.mrb[4].mxu0 %vm225_vm0, %v498_v17 }
  0xf0   : > { %v529_v19 = vpop.f32.mrb[0].mxu0  ;;  %v538_v20 = vpop.f32.mrb[0].mxu1 }
  0xf1   : > { %v328_v21 = vadd.f32 %v529_v19, %v468_v18  ;;  %v322_v22 = vpop.f32.mrb[1].mxu0  ;;  %v358_v23 = vadd.f32 %v538_v20, %v468_v18  ;;  %v352_v24 = vpop.f32.mrb[1].mxu1 }
  0xf2   : > { %v323_v25 = vadd.f32 %v468_v18, %v322_v22  ;;  %v353_v26 = vadd.f32 %v468_v18, %v352_v24 }
  0xf3   : > { %372 = vst [vmem:[%s754_s11 + $0x8] sm:$0xff] %v328_v21  ;;  %378 = vst [vmem:[%s754_s11 + $0x38] sm:$0xff] %v358_v23 }
  0xf4   : > { %371 = vst [vmem:[%s754_s11] sm:$0xff] %v323_v25  ;;  %v532_v27 = vpop.f32.mrb[2].mxu0  ;;  %377 = vst [vmem:[%s754_s11 + $0x30] sm:$0xff] %v353_v26  ;;  %v541_v28 = vpop.f32.mrb[2].mxu1 }
  0xf5   : > { %v338_v29 = vadd.f32 %v532_v27, %v468_v18  ;;  %v332_v30 = vpop.f32.mrb[3].mxu0  ;;  %v368_v31 = vadd.f32 %v541_v28, %v468_v18  ;;  %v362_v32 = vpop.f32.mrb[3].mxu1 }
  0xf6   : > { %v333_v33 = vadd.f32 %v468_v18, %v332_v30  ;;  %v363_v34 = vadd.f32 %v468_v18, %v362_v32  ;;  %388 = sbr.rel (!%p714_p5) target bundleno = 281 (0x119), region = 36 }
  0xf7   : > { %374 = vst [vmem:[%s754_s11 + $0x18] sm:$0xff] %v338_v29  ;;  %380 = vst [vmem:[%s754_s11 + $0x48] sm:$0xff] %v368_v31 }
  0xf8   : > { %373 = vst [vmem:[%s754_s11 + $0x10] sm:$0xff] %v333_v33  ;;  %v535_v35 = vpop.f32.mrb[4].mxu0  ;;  %379 = vst [vmem:[%s754_s11 + $0x40] sm:$0xff] %v363_v34 }
  0xf9   : > { %v348_v36 = vadd.f32 %v535_v35, %v468_v18  ;;  %v342_v37 = vpop.f32.mrb[5].mxu0 }
  0xfa   : > { %v343_v38 = vadd.f32 %v468_v18, %v342_v37 }
  0xfb   : > { %376 = vst [vmem:[%s754_s11 + $0x28] sm:$0xff] %v348_v36 }
  0xfc   : > { %375 = vst [vmem:[%s754_s11 + $0x20] sm:$0xff] %v343_v38 }
  0xfd   : > { %s840_s19 = smov (!%p391_p11, %s390_s19), 10 }
  0xfe   : > { %s773_s20 = sshll.u32 %s840_s19, 7 }
  0xff   : > { %s395_s24 = ssub.s32 1280, %s773_s20 }
 0x100   : > { %396 = vsyncadd %s768_s17, %s395_s24  ;;  %p480_p12 = scmp.ne.s32.totalorder %s773_s20, 0  ;;  %s486_s25 = smul.u32 1280, %s697_s16 }
 0x101   : > { %s401_s26 = sshll.u32 %s754_s11, 4  ;;  %s653_s30 = smov [#allocation2]   ;;  %s785_s26 = int_to_ptr.vmem [resolvable:$true] %s401_s26 }
 0x102   : > { %s783_s29 = scalar_lea.hbm %s832_s3, %s486_s25  ;;  %s589_s28 = scalar_lea.vmem %s785_s26, %s773_s20 }
 0x103   : > { %p590_p13 = scmp.ne.s32.totalorder %s785_s26, %s589_s28  ;;  %s593_s4 = sshll.u32 %s653_s30, 4  ;;  %s594_s4 = int_to_ptr.vmem [resolvable:$false] %s593_s4 }
 0x104   : > { %s595_s16 = scalar_lea.vmem %s594_s4, 2560  ;;  %p596_p2 = scmp.lt.s32.totalorder %s785_s26, %s594_s4 }
 0x105   : > { %p591_p0 = pnand %p590_p13, %p480_p12  ;;  %p597_p3 = scmp.lt.s32.totalorder %s595_s16, %s589_s28 }
 0x107   : > { %p592_p1 = pneg %p591_p0  ;;  %p598_p4 = por %p597_p3, %p596_p2 }
 0x109   : > { %p599_p5 = pnand %p598_p4, %p592_p1 }
 0x10b   : > { %602 = shalt.err (!%p599_p5)
}
 0x10c   : > { %s603_s5 = scalar_lea.hbm %s783_s29, %s773_s20  ;;  %s607_s8 = scalar_lea.hbm %s832_s3, 4864 }
 0x10d   : > { %p604_p7 = scmp.ne.s32.totalorder %s783_s29, %s603_s5  ;;  %p608_p10 = scmp.lt.u32.totalorder %s783_s29, %s832_s3 }
 0x10e   : > { %p609_p11 = scmp.lt.u32.totalorder %s607_s8, %s603_s5  ;;  %p611_p0 = scmp.lt.u32.totalorder %s603_s5, %s783_s29 }
 0x10f   : > { %p605_p8 = pnand %p604_p7, %p480_p12 }
 0x110   : > { %p610_p13 = por %p609_p11, %p608_p10 }
 0x111   : > { %p606_p9 = pneg %p605_p8 }
 0x112   : > { %p612_p1 = por %p611_p0, %p610_p13 }
 0x114   : > { %p613_p2 = pnand %p612_p1, %p606_p9 }
 0x116   : > { %616 = shalt.err (!%p613_p2)
}
 0x117   : > { %s654_s11 = smov 128   ;;  %s655_s19 = smov 8  }
 0x118   : > { %407 = dma.vmem_to_hbm [thread:$0]  (%p480_p12), %s785_s26, %s773_s20, %s783_s29, %s768_s17, %s654_s11, %s654_s11, %s655_s19  }
 0x119 PF: > { %p554_p3 = scmp.ge.s32.totalorder %s651_s15, 2  ;;  %s416_s24 = sand.u32 1, %s639_s12  }
 0x11a   : > { %s417_s25 = scalar_lea.sflag [#allocation3], %s416_s24 }
 0x11b   : > { %p551_p4 = pnand %p554_p3, %p718_p6 }
 0x11d   : > { %634 = dma.done.wait (!%p551_p4), %s417_s25, 1280  }
 0x11e   : > { %636 = vsyncadd (!%p551_p4), %s417_s25, 4294966016  ;;  %p13_p5 = scmp.ge.s32.totalorder %s701_s18, 6   ;;  %s835_s12 = smov %s643_s13 }
 0x11f   : > { %s836_s13 = smov %s647_s14  ;;  %s837_s14 = smov %s712_s21 }
 0x120   : > { %s838_s15 = smov %s701_s18  ;;  %15 = sbr.rel (!%p13_p5) target bundleno = 3 (0x3), region = 67 }
 0x127   :  { %422 = vsyncpa [#allocation3], 1 }
 0x128   :  { %424 = vsyncpa [#allocation3 + $0x1], 1 }

// kernel: tpu_custom_call.1
= control target key start
LH: loop header
LB: loop body
LE: loop exit
PB: predicated region body
PF: predicated region fallthrough
CT: control target
= control target key end

     0   :  { %8 = vsyncpa [#allocation3], 0  ;;  %s829_s0 = inlined_call_operand.vmem [shape: bf16[300,16], index: 0, kind: input, shape index: {}]   ;;  %s830_s1 = inlined_call_operand.vmem [shape: f32[16,128], index: 1, kind: input, shape index: {}]   ;;  %s831_s2 = inlined_call_operand.vmem [shape: f32[1,128], index: 2, kind: input, shape index: {}]   ;;  %s832_s3 = inlined_call_operand.hbm [shape: f32[300,128], index: 3, kind: output, shape index: {}]  }
   0x1   :  { %10 = vsyncpa [#allocation3 + $0x1], 0  ;;  %s676_s12 = smov 0   ;;  %s678_s13 = smov 0  }
   0x2   :  { %s680_s14 = smov 0   ;;  %s682_s15 = smov 0  }
   0x3 LB: > { %s697_s16 = sadd.s32 4294967295, %s651_s15   ;;  %s463_s17 = sadd.s32 4294967294, %s651_s15   ;;  %s651_s15 = sphi %s682_s15, %s838_s15   ;;  %s647_s14 = sphi %s680_s14, %s837_s14   ;;  %s643_s13 = sphi %s678_s13, %s836_s13   ;;  %s639_s12 = sphi %s676_s12, %s835_s12  }
   0x4   : > { %s701_s18 = sadd.s32 1, %s651_s15   ;;  %s91_s19 = sadd.s32 1, %s647_s14 }
   0x5   : > { %s88_s20 = ssub.s32 %s651_s15, %s701_s18  ;;  %p101_p0 = scmp.ne.s32.totalorder %s647_s14, %s643_s13 }
   0x6   : > { %p89_p1 = scmp.eq.s32.totalorder %s88_s20, 0  ;;  %p102_p2 = scmp.eq.s32.totalorder %s697_s16, 3 }
   0x7   : > { %p107_p3 = scmp.ne.s32.totalorder %s643_s13, %s639_s12  ;;  %p108_p4 = scmp.eq.s32.totalorder %s463_s17, 3 }
   0x8   : > { %s712_s21 = scalar_select %p89_p1, %s647_s14, %s91_s19  }
   0x9   : > { %p714_p5 = por %p102_p2, %p101_p0  ;;  %p718_p6 = por %p108_p4, %p107_p3 }
   0xa   : > { %p466_p7 = scmp.ge.s32.totalorder %s651_s15, 1  ;;  %p149_p8 = scmp.lt.s32.totalorder %s651_s15, 5 }
   0xc   : > { %p150_p9 = pnand %p466_p7, %p149_p8 }
   0xd   : > { %v216_v0 = vld [vmem:[%s830_s1] sm:$0xff] (!%p150_p9)  ;;  %v217_v1 = vld [vmem:[%s830_s1 + $0x8] sm:$0xff] (!%p150_p9)  ;;  %s731_s28 = smul.u32 (!%p150_p9), 10, %s697_s16  ;;  %vm225_vm0 = vcmask (!%p150_p9), 130048   ;;  %s174_s7 = sand.u32 (!%p150_p9), 1, %s643_s13  }
   0xe   : > { %153 = sbr.rel (%p150_p9) target bundleno = 281 (0x119), region = 32  ;;  %v542_v2 = vpack.c.bf16 (!%p150_p9), %v217_v1, %v216_v0  ;;  %v468_v18 = vld [vmem:[%s831_s2] ss:$0 sm:$0xff] (!%p150_p9)  ;;  %s768_s17 = scalar_lea.sflag (!%p150_p9), [#allocation3], %s174_s7 }
   0xf   : > { %p182_p10 = scmp.lt.s32.totalorder (!%p150_p9), %s731_s28, 37  ;;  %s548_s8 = smul.u32 (!%p150_p9), 80, %s174_s7 }
  0x10   : > { %543 = vmatprep.subr.bf16.mxu0 (!%p150_p9), %v542_v2  ;;  %546 = vmatprep.subr.bf16.mxu1 (!%p150_p9), %v542_v2 }
  0x11   : > { %545 = vmatpush3.bf16.msra.mxu0 (!%p150_p9), %v542_v2  ;;  %547 = vmatpush3.bf16.msra.mxu1 (!%p150_p9), %v542_v2  ;;  %s754_s11 = scalar_lea.vmem (!%p150_p9), [#allocation2], %s548_s8 }
  0x15   : > { %s183_s29 = scalar_select %p182_p10, %s731_s28, 37 }
  0x16   : > { %s390_s19 = ssub.s32 (%p714_p5), 38, %s731_s28 }
  0x17   : > { %s467_s30 = sshll.u32 %s183_s29, 2  ;;  %p391_p11 = scmp.lt.s32.totalorder (%p714_p5), %s390_s19, 10 }
  0x18   : > { %s185_s6 = scalar_lea.vmem %s829_s0, %s467_s30 }
  0x19   : > { %v488_v3 = vld [vmem:[%s185_s6] sm:$0xff]   ;;  %v509_v4 = vld [vmem:[%s185_s6 + $0x18] sm:$0xff]   ;;  %v507_v5 = vld [vmem:[%s185_s6 + $0x8] sm:$0xff]  }
  0x1a   : > { %v489_v6 = vunpack.c.l.bf16 %v488_v3  ;;  %v490_v7 = vunpack.c.h.bf16 %v488_v3  ;;  %v501_v8 = vunpack.c.l.bf16 %v509_v4  ;;  %v502_v9 = vunpack.c.h.bf16 %v509_v4  ;;  %v510_v10 = vld [vmem:[%s185_s6 + $0x20] sm:$0xff]   ;;  %v508_v13 = vld [vmem:[%s185_s6 + $0x10] sm:$0xff]  }
  0x1b   : > { %v493_v11 = vunpack.c.l.bf16 %v507_v5  ;;  %v505_v12 = vunpack.c.l.bf16 %v510_v10  ;;  %v494_v14 = vunpack.c.h.bf16 %v507_v5  ;;  %v506_v15 = vunpack.c.h.bf16 %v510_v10 }
  0x1c   : > { %527 = vmatprep.mubr.msk.f32.mxu0 %vm225_vm0, %v489_v6  ;;  %536 = vmatprep.mubr.msk.f32.mxu1 %vm225_vm0, %v501_v8  ;;  %v497_v16 = vunpack.c.l.bf16 %v508_v13  ;;  %v498_v17 = vunpack.c.h.bf16 %v508_v13 }
  0x1d   : > { %528 = vmatmul.mubr.msk.f32.vlgmr.msra.gmra.mrb[0].mxu0 %vm225_vm0, %v490_v7  ;;  %537 = vmatmul.mubr.msk.f32.vlgmr.msra.gmra.mrb[0].mxu1 %vm225_vm0, %v502_v9 }
  0x1e   : > { %530 = vmatprep.mubr.msk.f32.mxu0 %vm225_vm0, %v493_v11  ;;  %539 = vmatprep.mubr.msk.f32.mxu1 %vm225_vm0, %v505_v12 }
  0x21   : > { %531 = vmatmul.mubr.msk.f32.gmra.mrb[2].mxu0 %vm225_vm0, %v494_v14  ;;  %540 = vmatmul.mubr.msk.f32.gmra.mrb[2].mxu1 %vm225_vm0, %v506_v15 }
  0x22   : > { %533 = vmatprep.mubr.msk.f32.mxu0 %vm225_vm0, %v497_v16 }
  0x25   : > { %534 = vmatmul.mubr.msk.f32.gmra.mrb[4].mxu0 %vm225_vm0, %v498_v17 }
  0xf0   : > { %v529_v19 = vpop.f32.mrb[0].mxu0  ;;  %v538_v20 = vpop.f32.mrb[0].mxu1 }
  0xf1   : > { %v328_v21 = vadd.f32 %v529_v19, %v468_v18  ;;  %v322_v22 = vpop.f32.mrb[1].mxu0  ;;  %v358_v23 = vadd.f32 %v538_v20, %v468_v18  ;;  %v352_v24 = vpop.f32.mrb[1].mxu1 }
  0xf2   : > { %v323_v25 = vadd.f32 %v468_v18, %v322_v22  ;;  %v353_v26 = vadd.f32 %v468_v18, %v352_v24 }
  0xf3   : > { %372 = vst [vmem:[%s754_s11 + $0x8] sm:$0xff] %v328_v21  ;;  %378 = vst [vmem:[%s754_s11 + $0x38] sm:$0xff] %v358_v23 }
  0xf4   : > { %371 = vst [vmem:[%s754_s11] sm:$0xff] %v323_v25  ;;  %v532_v27 = vpop.f32.mrb[2].mxu0  ;;  %377 = vst [vmem:[%s754_s11 + $0x30] sm:$0xff] %v353_v26  ;;  %v541_v28 = vpop.f32.mrb[2].mxu1 }
  0xf5   : > { %v338_v29 = vadd.f32 %v532_v27, %v468_v18  ;;  %v332_v30 = vpop.f32.mrb[3].mxu0  ;;  %v368_v31 = vadd.f32 %v541_v28, %v468_v18  ;;  %v362_v32 = vpop.f32.mrb[3].mxu1 }
  0xf6   : > { %v333_v33 = vadd.f32 %v468_v18, %v332_v30  ;;  %v363_v34 = vadd.f32 %v468_v18, %v362_v32  ;;  %388 = sbr.rel (!%p714_p5) target bundleno = 281 (0x119), region = 36 }
  0xf7   : > { %374 = vst [vmem:[%s754_s11 + $0x18] sm:$0xff] %v338_v29  ;;  %380 = vst [vmem:[%s754_s11 + $0x48] sm:$0xff] %v368_v31 }
  0xf8   : > { %373 = vst [vmem:[%s754_s11 + $0x10] sm:$0xff] %v333_v33  ;;  %v535_v35 = vpop.f32.mrb[4].mxu0  ;;  %379 = vst [vmem:[%s754_s11 + $0x40] sm:$0xff] %v363_v34 }
  0xf9   : > { %v348_v36 = vadd.f32 %v535_v35, %v468_v18  ;;  %v342_v37 = vpop.f32.mrb[5].mxu0 }
  0xfa   : > { %v343_v38 = vadd.f32 %v468_v18, %v342_v37 }
  0xfb   : > { %376 = vst [vmem:[%s754_s11 + $0x28] sm:$0xff] %v348_v36 }
  0xfc   : > { %375 = vst [vmem:[%s754_s11 + $0x20] sm:$0xff] %v343_v38 }
  0xfd   : > { %s840_s19 = smov (!%p391_p11, %s390_s19), 10 }
  0xfe   : > { %s773_s20 = sshll.u32 %s840_s19, 7 }
  0xff   : > { %s395_s24 = ssub.s32 1280, %s773_s20 }
 0x100   : > { %396 = vsyncadd %s768_s17, %s395_s24  ;;  %p480_p12 = scmp.ne.s32.totalorder %s773_s20, 0  ;;  %s486_s25 = smul.u32 1280, %s697_s16 }
 0x101   : > { %s401_s26 = sshll.u32 %s754_s11, 4  ;;  %s653_s30 = smov [#allocation2]   ;;  %s785_s26 = int_to_ptr.vmem [resolvable:$true] %s401_s26 }
 0x102   : > { %s783_s29 = scalar_lea.hbm %s832_s3, %s486_s25  ;;  %s589_s28 = scalar_lea.vmem %s785_s26, %s773_s20 }
 0x103   : > { %p590_p13 = scmp.ne.s32.totalorder %s785_s26, %s589_s28  ;;  %s593_s4 = sshll.u32 %s653_s30, 4  ;;  %s594_s4 = int_to_ptr.vmem [resolvable:$false] %s593_s4 }
 0x104   : > { %s595_s16 = scalar_lea.vmem %s594_s4, 2560  ;;  %p596_p2 = scmp.lt.s32.totalorder %s785_s26, %s594_s4 }
 0x105   : > { %p591_p0 = pnand %p590_p13, %p480_p12  ;;  %p597_p3 = scmp.lt.s32.totalorder %s595_s16, %s589_s28 }
 0x107   : > { %p592_p1 = pneg %p591_p0  ;;  %p598_p4 = por %p597_p3, %p596_p2 }
 0x109   : > { %p599_p5 = pnand %p598_p4, %p592_p1 }
 0x10b   : > { %602 = shalt.err (!%p599_p5)
}
 0x10c   : > { %s603_s5 = scalar_lea.hbm %s783_s29, %s773_s20  ;;  %s607_s8 = scalar_lea.hbm %s832_s3, 4864 }
 0x10d   : > { %p604_p7 = scmp.ne.s32.totalorder %s783_s29, %s603_s5  ;;  %p608_p10 = scmp.lt.u32.totalorder %s783_s29, %s832_s3 }
 0x10e   : > { %p609_p11 = scmp.lt.u32.totalorder %s607_s8, %s603_s5  ;;  %p611_p0 = scmp.lt.u32.totalorder %s603_s5, %s783_s29 }
 0x10f   : > { %p605_p8 = pnand %p604_p7, %p480_p12 }
 0x110   : > { %p610_p13 = por %p609_p11, %p608_p10 }
 0x111   : > { %p606_p9 = pneg %p605_p8 }
 0x112   : > { %p612_p1 = por %p611_p0, %p610_p13 }
 0x114   : > { %p613_p2 = pnand %p612_p1, %p606_p9 }
 0x116   : > { %616 = shalt.err (!%p613_p2)
}
 0x117   : > { %s654_s11 = smov 128   ;;  %s655_s19 = smov 8  }
 0x118   : > { %407 = dma.vmem_to_hbm [thread:$0]  (%p480_p12), %s785_s26, %s773_s20, %s783_s29, %s768_s17, %s654_s11, %s654_s11, %s655_s19  }
 0x119 PF: > { %p554_p3 = scmp.ge.s32.totalorder %s651_s15, 2  ;;  %s416_s24 = sand.u32 1, %s639_s12  }
 0x11a   : > { %s417_s25 = scalar_lea.sflag [#allocation3], %s416_s24 }
 0x11b   : > { %p551_p4 = pnand %p554_p3, %p718_p6 }
 0x11d   : > { %634 = dma.done.wait (!%p551_p4), %s417_s25, 1280  }
 0x11e   : > { %636 = vsyncadd (!%p551_p4), %s417_s25, 4294966016  ;;  %p13_p5 = scmp.ge.s32.totalorder %s701_s18, 6   ;;  %s835_s12 = smov %s643_s13 }
 0x11f   : > { %s836_s13 = smov %s647_s14  ;;  %s837_s14 = smov %s712_s21 }
 0x120   : > { %s838_s15 = smov %s701_s18  ;;  %15 = sbr.rel (!%p13_p5) target bundleno = 3 (0x3), region = 67 }
 0x127   :  { %422 = vsyncpa [#allocation3], 1 }
 0x128   :  { %424 = vsyncpa [#allocation3 + $0x1], 1 }

</bundles_post_ra>
